<compile_context>
chip_gen: v6e
topology: v6e:2x2x1
jax: 0.10.0
libtpu: 0.0.40
codegen_flags: <defaults>
</compile_context>

<pallas_src>
import jax
import jax.numpy as jnp
from jax.experimental import pallas as pl
from jax.experimental.pallas import tpu as pltpu

EPS = 1e-5


def _round_up(x, m):
    return (x + m - 1) // m * m


def _conv_stats_kernel(p_ref, w_ref, h_ref, stats_ref):
    # p_ref: (TILE_M, KP) bf16   w_ref: (KP, C1P) bf16
    # h_ref: (TILE_M, C1P) f32   stats_ref: (8, C1P) f32 (row0=sum, row1=sumsq)
    h = jnp.dot(p_ref[...], w_ref[...], preferred_element_type=jnp.float32)
    h_ref[...] = h
    # Single-pass partial statistics for this tile (merged globally in glue).
    s = jnp.sum(h, axis=0, keepdims=True)
    sq = jnp.sum(h * h, axis=0, keepdims=True)
    pad = jnp.zeros((6, h.shape[1]), jnp.float32)
    stats_ref[...] = jnp.concatenate([s, sq, pad], axis=0)


def _bn_relu_kernel(h_ref, scale_ref, shift_ref, out_ref):
    # Folded BN (scale/shift) + ReLU, f32 epilogue math.
    out_ref[...] = jnp.maximum(h_ref[...] * scale_ref[...] + shift_ref[...], 0.0)


@jax.jit
def cbr_forward(x_nchw, weight, bias, gamma, beta):
    """CBR forward (sample='down', bn=True, activation=ReLU, dropout=False).

    x_nchw : (N, C0, H, W)  float32
    weight : (C1, C0, 4, 4) float32  (PyTorch Conv2d layout)
    bias   : (C1,)   (cancelled exactly by train-mode BN mean subtraction)
    gamma  : (C1,)   BatchNorm weight
    beta   : (C1,)   BatchNorm bias
    returns: (N, C1, OH, OW) float32
    """
    del bias  # constant per-channel bias cancels under training-mode BN.

    N, C0, H, W = x_nchw.shape
    C1, _, KH, KW = weight.shape
    SH = SW = 2
    PH = PW = 1
    OH = (H + 2 * PH - KH) // SH + 1
    OW = (W + 2 * PW - KW) // SW + 1

    M = N * OH * OW
    K = KH * KW * C0

    # Lane-dense padding and M tiling (sublane-aligned).
    C1P = _round_up(C1, 128)
    KP = _round_up(K, 128)
    TILE_M = min(512, _round_up(M, 8))
    GRID_M = -(-M // TILE_M)
    MP = GRID_M * TILE_M

    # ---- im2col glue (NCHW -> NHWC -> padded -> (M, K) patches) ----
    # TODO(synk): build the patch tile inside the kernel from an input row-slab
    # DMA to avoid materializing the 16x-duplicated im2col array in HBM.
    x = jnp.transpose(x_nchw, (0, 2, 3, 1))
    xp = jnp.pad(x, ((0, 0), (PH, PH), (PW, PW), (0, 0)))
    slices = []
    for kh in range(KH):
        for kw in range(KW):
            slices.append(xp[:, kh:kh + SH * OH:SH, kw:kw + SW * OW:SW, :])
    patches = jnp.stack(slices, axis=3).reshape(M, K)
    patches = jnp.pad(patches, ((0, MP - M), (0, KP - K))).astype(jnp.bfloat16)

    # weight (C1, C0, KH, KW) -> (KH, KW, C0, C1) -> (K, C1), zero-padded.
    w_mat = jnp.transpose(weight, (2, 3, 1, 0)).reshape(K, C1)
    w_mat = jnp.pad(w_mat, ((0, KP - K), (0, C1P - C1))).astype(jnp.bfloat16)

    cparams = pltpu.CompilerParams(
        dimension_semantics=("parallel",),
        vmem_limit_bytes=32 * 1024 * 1024,
    )

    # ---- Pass 1: conv matmul + per-tile BN partial stats ----
    h, stats = pl.pallas_call(
        _conv_stats_kernel,
        grid=(GRID_M,),
        in_specs=[
            pl.BlockSpec((TILE_M, KP), lambda i: (i, 0)),
            pl.BlockSpec((KP, C1P), lambda i: (0, 0)),
        ],
        out_specs=[
            pl.BlockSpec((TILE_M, C1P), lambda i: (i, 0)),
            pl.BlockSpec((8, C1P), lambda i: (i, 0)),
        ],
        out_shape=[
            jax.ShapeDtypeStruct((MP, C1P), jnp.float32),
            jax.ShapeDtypeStruct((GRID_M * 8, C1P), jnp.float32),
        ],
        compiler_params=cparams,
    )(patches, w_mat)

    # ---- Glue: merge partial stats -> global mean/var -> folded scale/shift ----
    # Padded rows of `patches` are zero and (bias dropped) contribute zero to
    # both sums, so dividing by the true M is exact.
    tot = stats.reshape(GRID_M, 8, C1P).sum(axis=0)
    total, total_sq = tot[0], tot[1]
    inv_m = 1.0 / jnp.float32(M)
    mean = total * inv_m
    var = jnp.maximum(total_sq * inv_m - mean * mean, 0.0)  # biased (train-mode fwd)
    inv_std = jax.lax.rsqrt(var + EPS)
    gamma_p = jnp.pad(gamma.astype(jnp.float32), (0, C1P - C1))
    beta_p = jnp.pad(beta.astype(jnp.float32), (0, C1P - C1))
    scale = (gamma_p * inv_std).reshape(1, C1P)
    shift = (beta_p - mean * gamma_p * inv_std).reshape(1, C1P)

    # ---- Pass 2: normalize + ReLU ----
    out = pl.pallas_call(
        _bn_relu_kernel,
        grid=(GRID_M,),
        in_specs=[
            pl.BlockSpec((TILE_M, C1P), lambda i: (i, 0)),
            pl.BlockSpec((1, C1P), lambda i: (0, 0)),
            pl.BlockSpec((1, C1P), lambda i: (0, 0)),
        ],
        out_specs=pl.BlockSpec((TILE_M, C1P), lambda i: (i, 0)),
        out_shape=jax.ShapeDtypeStruct((MP, C1P), jnp.float32),
        compiler_params=cparams,
    )(h, scale, shift)

    # (MP, C1P) -> crop padding -> (N, OH, OW, C1) -> NCHW
    out = out[:M, :C1].reshape(N, OH, OW, C1)
    return jnp.transpose(out, (0, 3, 1, 2))


if __name__ == "__main__":
    # Small shapes consistent with CBR(ch0=4, ch1=8, sample='down').
    N, C0, H, W = 2, 4, 16, 16
    C1 = 8

    key = jax.random.PRNGKey(0)
    kx, kw, kb = jax.random.split(key, 3)

    x = jax.random.normal(kx, (N, C0, H, W), dtype=jnp.float32)
    weight = 0.1 * jax.random.normal(kw, (C1, C0, 4, 4), dtype=jnp.float32)
    bias = 0.05 * jax.random.normal(kb, (C1,), dtype=jnp.float32)
    gamma = jnp.ones((C1,), dtype=jnp.float32)   # BatchNorm2d affine default
    beta = jnp.zeros((C1,), dtype=jnp.float32)

    # TODO(synk): dropout branch (dropout=False by default) and ConvTranspose
    # ('up' sample) path are not implemented; BN running-stat updates are not
    # produced (forward output only).
    y = cbr_forward(x, weight, bias, gamma, beta)
    jax.block_until_ready(y)
    assert y.shape == (N, C1, H // 2, W // 2)

    # Reference check in plain JAX (f32 conv + train-mode BN + ReLU).
    ref = jax.lax.conv_general_dilated(
        x, weight, window_strides=(2, 2), padding=((1, 1), (1, 1)),
        dimension_numbers=("NCHW", "OIHW", "NCHW"))
    ref = ref + bias[None, :, None, None]
    mu = jnp.mean(ref, axis=(0, 2, 3), keepdims=True)
    var = jnp.mean((ref - mu) ** 2, axis=(0, 2, 3), keepdims=True)
    ref = (ref - mu) * jax.lax.rsqrt(var + EPS)
    ref = ref * gamma[None, :, None, None] + beta[None, :, None, None]
    ref = jnp.maximum(ref, 0.0)
    err = float(jnp.max(jnp.abs(y - ref)))
    assert err < 5e-2, err

    print("KERNEL_OK")
</pallas_src>

<mosaic_0001>
module attributes {stable_mosaic.version = 11 : i64} {
  func.func @_conv_stats_kernel(%arg0: i32, %arg1: memref<128x128xbf16, #tpu.memory_space<vmem>>, %arg2: memref<128x128xbf16, #tpu.memory_space<vmem>>, %arg3: memref<128x128xf32, #tpu.memory_space<vmem>>, %arg4: memref<8x128xf32, #tpu.memory_space<vmem>>) attributes {dimension_semantics = [#tpu.dimension_semantics<parallel>], iteration_bounds = array<i64: 1>, scalar_prefetch = 0 : i64, scratch_operands = 0 : i64, tpu.core_type = #tpu.core_type<tc>, window_params = [{transform_indices = @transform_0, window_bounds = array<i64: 128, 128>}, {pipeline_mode = #tpu.pipeline_mode<synchronous>, transform_indices = @transform_1, window_bounds = array<i64: 128, 128>}, {transform_indices = @transform_2, window_bounds = array<i64: 128, 128>}, {transform_indices = @transform_3, window_bounds = array<i64: 8, 128>}]} {
    %c0 = arith.constant 0 : index
    %c0_0 = arith.constant 0 : index
    %0 = vector.load %arg1[%c0, %c0_0] : memref<128x128xbf16, #tpu.memory_space<vmem>>, vector<128x128xbf16>
    %c0_1 = arith.constant 0 : index
    %c0_2 = arith.constant 0 : index
    %1 = vector.load %arg2[%c0_1, %c0_2] : memref<128x128xbf16, #tpu.memory_space<vmem>>, vector<128x128xbf16>
    %cst = arith.constant dense<0.000000e+00> : vector<128x128xf32>
    %2 = tpu.matmul %0, %1, %cst {dimension_numbers = #tpu.dot_dimension_numbers<[1], [0], [0], [1], [0, 0, 1, 1], [], []>} : vector<128x128xbf16>, vector<128x128xbf16>, vector<128x128xf32> -> vector<128x128xf32>
    %c0_3 = arith.constant 0 : index
    %c0_4 = arith.constant 0 : index
    %3 = vector.load %arg3[%c0_3, %c0_4] : memref<128x128xf32, #tpu.memory_space<vmem>>, vector<128x128xf32>
    tpu.vector_store %arg3[%c0_3, %c0_4], %2 {strides = array<i32>} : memref<128x128xf32, #tpu.memory_space<vmem>>, vector<128x128xf32>,
    %cst_5 = arith.constant dense<0.000000e+00> : vector<128xf32>
    %4 = vector.multi_reduction <add>, %2, %cst_5 [0] : vector<128x128xf32> to vector<128xf32>
    %5 = vector.shape_cast %4 : vector<128xf32> to vector<1x128xf32>
    %6 = arith.mulf %2, %2 : vector<128x128xf32>
    %cst_6 = arith.constant dense<0.000000e+00> : vector<128xf32>
    %7 = vector.multi_reduction <add>, %6, %cst_6 [0] : vector<128x128xf32> to vector<128xf32>
    %8 = vector.shape_cast %7 : vector<128xf32> to vector<1x128xf32>
    %cst_7 = arith.constant 0.000000e+00 : f32
    %9 = vector.broadcast %cst_7 : f32 to vector<6x128xf32>
    %10 = tpu.concatenate %5, %8, %9 in 0 : vector<1x128xf32>, vector<1x128xf32>, vector<6x128xf32> -> vector<8x128xf32>
    %c0_8 = arith.constant 0 : index
    %c0_9 = arith.constant 0 : index
    %11 = vector.load %arg4[%c0_8, %c0_9] : memref<8x128xf32, #tpu.memory_space<vmem>>, vector<8x128xf32>
    tpu.vector_store %arg4[%c0_8, %c0_9], %10 {strides = array<i32>} : memref<8x128xf32, #tpu.memory_space<vmem>>, vector<8x128xf32>,
    return
  }
  func.func @transform_0(%arg0: i32) -> (i32, i32) {
    %c0_i32 = arith.constant 0 : i32
    %c0_i32_0 = arith.constant 0 : i32
    return %arg0, %c0_i32 : i32, i32
  }
  func.func @transform_1(%arg0: i32) -> (i32, i32) {
    %c0_i32 = arith.constant 0 : i32
    %c0_i32_0 = arith.constant 0 : i32
    %c0_i32_1 = arith.constant 0 : i32
    return %c0_i32, %c0_i32_0 : i32, i32
  }
  func.func @transform_2(%arg0: i32) -> (i32, i32) {
    %c0_i32 = arith.constant 0 : i32
    %c0_i32_0 = arith.constant 0 : i32
    return %arg0, %c0_i32 : i32, i32
  }
  func.func @transform_3(%arg0: i32) -> (i32, i32) {
    %c0_i32 = arith.constant 0 : i32
    %c0_i32_0 = arith.constant 0 : i32
    return %arg0, %c0_i32 : i32, i32
  }
}

module attributes {stable_mosaic.version = 11 : i64} {
  func.func @_bn_relu_kernel(%arg0: i32, %arg1: memref<128x128xf32, #tpu.memory_space<vmem>>, %arg2: memref<1x128xf32, #tpu.memory_space<vmem>>, %arg3: memref<1x128xf32, #tpu.memory_space<vmem>>, %arg4: memref<128x128xf32, #tpu.memory_space<vmem>>) attributes {dimension_semantics = [#tpu.dimension_semantics<parallel>], iteration_bounds = array<i64: 1>, scalar_prefetch = 0 : i64, scratch_operands = 0 : i64, tpu.core_type = #tpu.core_type<tc>, window_params = [{transform_indices = @transform_0, window_bounds = array<i64: 128, 128>}, {pipeline_mode = #tpu.pipeline_mode<synchronous>, transform_indices = @transform_1, window_bounds = array<i64: 1, 128>}, {pipeline_mode = #tpu.pipeline_mode<synchronous>, transform_indices = @transform_2, window_bounds = array<i64: 1, 128>}, {transform_indices = @transform_3, window_bounds = array<i64: 128, 128>}]} {
    %c0 = arith.constant 0 : index
    %c0_0 = arith.constant 0 : index
    %0 = vector.load %arg1[%c0, %c0_0] : memref<128x128xf32, #tpu.memory_space<vmem>>, vector<128x128xf32>
    %c0_1 = arith.constant 0 : index
    %c0_2 = arith.constant 0 : index
    %1 = vector.load %arg2[%c0_1, %c0_2] : memref<1x128xf32, #tpu.memory_space<vmem>>, vector<1x128xf32>
    %2 = vector.broadcast %1 : vector<1x128xf32> to vector<128x128xf32>
    %3 = arith.mulf %0, %2 : vector<128x128xf32>
    %c0_3 = arith.constant 0 : index
    %c0_4 = arith.constant 0 : index
    %4 = vector.load %arg3[%c0_3, %c0_4] : memref<1x128xf32, #tpu.memory_space<vmem>>, vector<1x128xf32>
    %5 = vector.broadcast %4 : vector<1x128xf32> to vector<128x128xf32>
    %6 = arith.addf %3, %5 : vector<128x128xf32>
    %cst = arith.constant 0.000000e+00 : f32
    %7 = vector.broadcast %cst : f32 to vector<128x128xf32>
    %8 = arith.maximumf %6, %7 : vector<128x128xf32>
    %c0_5 = arith.constant 0 : index
    %c0_6 = arith.constant 0 : index
    %9 = vector.load %arg4[%c0_5, %c0_6] : memref<128x128xf32, #tpu.memory_space<vmem>>, vector<128x128xf32>
    tpu.vector_store %arg4[%c0_5, %c0_6], %8 {strides = array<i32>} : memref<128x128xf32, #tpu.memory_space<vmem>>, vector<128x128xf32>,
    return
  }
  func.func @transform_0(%arg0: i32) -> (i32, i32) {
    %c0_i32 = arith.constant 0 : i32
    %c0_i32_0 = arith.constant 0 : i32
    return %arg0, %c0_i32 : i32, i32
  }
  func.func @transform_1(%arg0: i32) -> (i32, i32) {
    %c0_i32 = arith.constant 0 : i32
    %c0_i32_0 = arith.constant 0 : i32
    %c0_i32_1 = arith.constant 0 : i32
    return %c0_i32, %c0_i32_0 : i32, i32
  }
  func.func @transform_2(%arg0: i32) -> (i32, i32) {
    %c0_i32 = arith.constant 0 : i32
    %c0_i32_0 = arith.constant 0 : i32
    %c0_i32_1 = arith.constant 0 : i32
    return %c0_i32, %c0_i32_0 : i32, i32
  }
  func.func @transform_3(%arg0: i32) -> (i32, i32) {
    %c0_i32 = arith.constant 0 : i32
    %c0_i32_0 = arith.constant 0 : i32
    return %arg0, %c0_i32 : i32, i32
  }
}

</mosaic_0001>

<bundles_post_ra>
// kernel: cbr_forward.3
= control target key start
LH: loop header
LB: loop body
LE: loop exit
PB: predicated region body
PF: predicated region fallthrough
CT: control target
= control target key end

     0   :  { %s254_s0 = inlined_call_operand.vmem [shape: f32[128,128], index: 0, kind: input, shape index: {}]   ;;  %s255_s1 = inlined_call_operand.vmem [shape: f32[1,128], index: 1, kind: input, shape index: {}]   ;;  %s256_s2 = inlined_call_operand.vmem [shape: f32[1,128], index: 2, kind: input, shape index: {}]   ;;  %s257_s3 = inlined_call_operand.vmem [shape: f32[128,128], index: 3, kind: output, shape index: {}]  }
   0x1   :  { %v14_v0 = vld [vmem:[%s254_s0] sm:$0xff]  ;;  %v15_v4 = vld [vmem:[%s254_s0 + $0x8] sm:$0xff]  ;;  %v16_v5 = vld [vmem:[%s254_s0 + $0x10] sm:$0xff] }
   0x2   :  { %v112_v1 = vld [vmem:[%s255_s1] ss:$0 sm:$0xff]  ;;  %v17_v6 = vld [vmem:[%s254_s0 + $0x18] sm:$0xff]  ;;  %v19_v11 = vld [vmem:[%s254_s0 + $0x28] sm:$0xff] }
   0x3   :  { %v143_v2 = vld [vmem:[%s256_s2] ss:$0 sm:$0xff]  ;;  %v37_v3 = vmul.f32 %v112_v1, %v14_v0  ;;  %v38_v7 = vmul.f32 %v112_v1, %v15_v4  ;;  %v39_v8 = vmul.f32 %v112_v1, %v16_v5  ;;  %v40_v9 = vmul.f32 %v112_v1, %v17_v6  ;;  %v20_v12 = vld [vmem:[%s254_s0 + $0x30] sm:$0xff]  ;;  %v21_v17 = vld [vmem:[%s254_s0 + $0x38] sm:$0xff] }
   0x4   :  { %v18_v10 = vld [vmem:[%s254_s0 + $0x20] sm:$0xff]  ;;  %v42_v15 = vmul.f32 %v112_v1, %v19_v11  ;;  %v43_v16 = vmul.f32 %v112_v1, %v20_v12  ;;  %v44_v21 = vmul.f32 %v112_v1, %v21_v17  ;;  %v23_v27 = vld [vmem:[%s254_s0 + $0x48] sm:$0xff]  ;;  %v24_v28 = vld [vmem:[%s254_s0 + $0x50] sm:$0xff] }
   0x5   :  { %v60_v13 = vadd.f32 %v143_v2, %v37_v3  ;;  %v41_v14 = vmul.f32 %v112_v1, %v18_v10  ;;  %v61_v18 = vadd.f32 %v143_v2, %v38_v7  ;;  %v62_v19 = vadd.f32 %v143_v2, %v39_v8  ;;  %v22_v22 = vld [vmem:[%s254_s0 + $0x40] sm:$0xff]  ;;  %v25_v29 = vld [vmem:[%s254_s0 + $0x58] sm:$0xff]  ;;  %v27_v35 = vld [vmem:[%s254_s0 + $0x68] sm:$0xff] }
   0x6   :  { %v63_v20 = vadd.f32 %v143_v2, %v40_v9  ;;  %v65_v25 = vadd.f32 %v143_v2, %v42_v15  ;;  %v66_v26 = vadd.f32 %v143_v2, %v43_v16  ;;  %v67_v33 = vadd.f32 %v143_v2, %v44_v21  ;;  %v26_v34 = vld [vmem:[%s254_s0 + $0x60] sm:$0xff]  ;;  %v28_v36 = vld [vmem:[%s254_s0 + $0x70] sm:$0xff]  ;;  %v29_v41 = vld [vmem:[%s254_s0 + $0x78] sm:$0xff] }
   0x7   :  { %v76_v23 = vmax.f32 %v60_v13, 0.0  ;;  %v64_v24 = vadd.f32 %v143_v2, %v41_v14  ;;  %v77_v30 = vmax.f32 %v61_v18, 0.0  ;;  %v78_v31 = vmax.f32 %v62_v19, 0.0 }
   0x8   :  { %v79_v32 = vmax.f32 %v63_v20, 0.0  ;;  %v81_v38 = vmax.f32 %v65_v25, 0.0  ;;  %v82_v39 = vmax.f32 %v66_v26, 0.0  ;;  %v45_v40 = vmul.f32 %v112_v1, %v22_v22 }
   0x9   :  { %92 = vst [vmem:[%s257_s3] sm:$0xff] %v76_v23  ;;  %v80_v37 = vmax.f32 %v64_v24, 0.0  ;;  %93 = vst [vmem:[%s257_s3 + $0x8] sm:$0xff] %v77_v30  ;;  %v83_v42 = vmax.f32 %v67_v33, 0.0  ;;  %v46_v43 = vmul.f32 %v112_v1, %v23_v27  ;;  %v47_v44 = vmul.f32 %v112_v1, %v24_v28 }
   0xa   :  { %94 = vst [vmem:[%s257_s3 + $0x10] sm:$0xff] %v78_v31  ;;  %95 = vst [vmem:[%s257_s3 + $0x18] sm:$0xff] %v79_v32  ;;  %v48_v45 = vmul.f32 %v112_v1, %v25_v29  ;;  %v68_v46 = vadd.f32 %v143_v2, %v45_v40  ;;  %v49_v47 = vmul.f32 %v112_v1, %v26_v34 }
   0xb   :  { %96 = vst [vmem:[%s257_s3 + $0x20] sm:$0xff] %v80_v37  ;;  %97 = vst [vmem:[%s257_s3 + $0x28] sm:$0xff] %v81_v38  ;;  %v50_v48 = vmul.f32 %v112_v1, %v27_v35  ;;  %v51_v49 = vmul.f32 %v112_v1, %v28_v36  ;;  %v69_v50 = vadd.f32 %v143_v2, %v46_v43 }
   0xc   :  { %98 = vst [vmem:[%s257_s3 + $0x30] sm:$0xff] %v82_v39  ;;  %99 = vst [vmem:[%s257_s3 + $0x38] sm:$0xff] %v83_v42  ;;  %v70_v51 = vadd.f32 %v143_v2, %v47_v44  ;;  %v71_v52 = vadd.f32 %v143_v2, %v48_v45  ;;  %v52_v53 = vmul.f32 %v112_v1, %v29_v41  ;;  %v84_v54 = vmax.f32 %v68_v46, 0.0 }
   0xd   :  { %v72_v55 = vadd.f32 %v143_v2, %v49_v47  ;;  %v73_v56 = vadd.f32 %v143_v2, %v50_v48  ;;  %v74_v57 = vadd.f32 %v143_v2, %v51_v49  ;;  %v85_v58 = vmax.f32 %v69_v50, 0.0 }
   0xe   :  { %v86_v59 = vmax.f32 %v70_v51, 0.0  ;;  %v87_v60 = vmax.f32 %v71_v52, 0.0  ;;  %v75_v61 = vadd.f32 %v143_v2, %v52_v53  ;;  %100 = vst [vmem:[%s257_s3 + $0x40] sm:$0xff] %v84_v54 }
   0xf   :  { %v88_v62 = vmax.f32 %v72_v55, 0.0  ;;  %v89_v63 = vmax.f32 %v73_v56, 0.0  ;;  %v90_v0 = vmax.f32 %v74_v57, 0.0  ;;  %101 = vst [vmem:[%s257_s3 + $0x48] sm:$0xff] %v85_v58 }
  0x10   :  { %102 = vst [vmem:[%s257_s3 + $0x50] sm:$0xff] %v86_v59  ;;  %103 = vst [vmem:[%s257_s3 + $0x58] sm:$0xff] %v87_v60  ;;  %v91_v1 = vmax.f32 %v75_v61, 0.0 }
  0x11   :  { %104 = vst [vmem:[%s257_s3 + $0x60] sm:$0xff] %v88_v62  ;;  %105 = vst [vmem:[%s257_s3 + $0x68] sm:$0xff] %v89_v63 }
  0x12   :  { %106 = vst [vmem:[%s257_s3 + $0x70] sm:$0xff] %v90_v0  ;;  %107 = vst [vmem:[%s257_s3 + $0x78] sm:$0xff] %v91_v1 }

// kernel: cbr_forward.2
= control target key start
LH: loop header
LB: loop body
LE: loop exit
PB: predicated region body
PF: predicated region fallthrough
CT: control target
= control target key end

     0   :  { %vm313_vm0 = vcmask 1040384   ;;  %vm315_vm1 = vcmask 1041408   ;;  %s541_s1 = inlined_call_operand.vmem [shape: bf16[128,128], index: 1, kind: input, shape index: {}]   ;;  %s542_s0 = inlined_call_operand.vmem [shape: bf16[128,128], index: 0, kind: input, shape index: {}]   ;;  %s543_s2 = inlined_call_operand.vmem [shape: f32[128,128], index: 2, kind: output, shape index: {0}]   ;;  %s544_s3 = inlined_call_operand.vmem [shape: f32[8,128], index: 3, kind: output, shape index: {1}]  }
   0x1   :  { %v406_v0 = vld [vmem:[%s541_s1 + $0x38] sm:$0xff]   ;;  %v407_v1 = vld [vmem:[%s541_s1 + $0x30] sm:$0xff]   ;;  %v408_v2 = vld [vmem:[%s541_s1 + $0x28] sm:$0xff]  }
   0x2   :  { %358 = vmatprep.subr.bf16.mxu0 %v406_v0  ;;  %390 = vmatprep.subr.bf16.mxu1 %v406_v0  ;;  %v409_v3 = vld [vmem:[%s541_s1 + $0x20] sm:$0xff]   ;;  %v410_v5 = vld [vmem:[%s541_s1 + $0x18] sm:$0xff]   ;;  %v411_v7 = vld [vmem:[%s541_s1 + $0x10] sm:$0xff]  }
   0x3   :  { %359 = vmatpush3.bf16.msra.mxu0 %v406_v0  ;;  %398 = vmatpush3.bf16.msra.mxu1 %v406_v0  ;;  %v414_v4 = vld [vmem:[%s542_s0] sm:$0xff]   ;;  %v412_v8 = vld [vmem:[%s541_s1 + $0x8] sm:$0xff]   ;;  %v416_v12 = vld [vmem:[%s542_s0 + $0x10] sm:$0xff]  }
   0x4   :  { %360 = vmatprep.subr.bf16.mxu0 %v407_v1  ;;  %391 = vmatprep.subr.bf16.mxu1 %v407_v1  ;;  %v418_v6 = vld [vmem:[%s542_s0 + $0x20] sm:$0xff]   ;;  %v415_v10 = vld [vmem:[%s542_s0 + $0x8] sm:$0xff]   ;;  %v420_v13 = vld [vmem:[%s542_s0 + $0x30] sm:$0xff]  }
   0x5   :  { %374 = vmatprep.mubr.bf16.mxu0 %v414_v4  ;;  %382 = vmatprep.mubr.bf16.mxu1 %v418_v6  ;;  %v413_v9 = vld [vmem:[%s541_s1] sm:$0xff]   ;;  %v419_v11 = vld [vmem:[%s542_s0 + $0x28] sm:$0xff]   ;;  %v417_v14 = vld [vmem:[%s542_s0 + $0x18] sm:$0xff]  }
   0x6   :  { %v421_v15 = vld [vmem:[%s542_s0 + $0x38] sm:$0xff]  }
   0x7   :  { %361 = vmatpush3.bf16.msra.mxu0 %v407_v1  ;;  %399 = vmatpush3.bf16.msra.mxu1 %v407_v1 }
   0x8   :  { %362 = vmatprep.subr.bf16.mxu0 %v408_v2  ;;  %392 = vmatprep.subr.bf16.mxu1 %v408_v2 }
   0xb   :  { %363 = vmatpush3.bf16.msra.mxu0 %v408_v2  ;;  %400 = vmatpush3.bf16.msra.mxu1 %v408_v2 }
   0xc   :  { %364 = vmatprep.subr.bf16.mxu0 %v409_v3  ;;  %393 = vmatprep.subr.bf16.mxu1 %v409_v3 }
   0xf   :  { %365 = vmatpush3.bf16.msra.mxu0 %v409_v3  ;;  %401 = vmatpush3.bf16.msra.mxu1 %v409_v3 }
  0x10   :  { %366 = vmatprep.subr.bf16.mxu0 %v410_v5  ;;  %394 = vmatprep.subr.bf16.mxu1 %v410_v5 }
  0x13   :  { %367 = vmatpush3.bf16.msra.mxu0 %v410_v5  ;;  %402 = vmatpush3.bf16.msra.mxu1 %v410_v5 }
  0x14   :  { %368 = vmatprep.subr.bf16.mxu0 %v411_v7  ;;  %395 = vmatprep.subr.bf16.mxu1 %v411_v7 }
  0x17   :  { %369 = vmatpush3.bf16.msra.mxu0 %v411_v7  ;;  %403 = vmatpush3.bf16.msra.mxu1 %v411_v7 }
  0x18   :  { %370 = vmatprep.subr.bf16.mxu0 %v412_v8  ;;  %396 = vmatprep.subr.bf16.mxu1 %v412_v8 }
  0x1b   :  { %371 = vmatpush3.bf16.msra.mxu0 %v412_v8  ;;  %404 = vmatpush3.bf16.msra.mxu1 %v412_v8 }
  0x1c   :  { %372 = vmatprep.subr.bf16.mxu0 %v413_v9  ;;  %397 = vmatprep.subr.bf16.mxu1 %v413_v9 }
  0x1f   :  { %373 = vmatpush3.bf16.msra.mxu0 %v413_v9  ;;  %405 = vmatpush3.bf16.msra.mxu1 %v413_v9 }
  0x22   :  { %375 = vmatmul.mubr.bf16.vlgmr.msra.gmra.mxu0 %v415_v10  ;;  %383 = vmatmul.mubr.bf16.vlgmr.msra.gmra.mxu1 %v419_v11 }
  0x23   :  { %378 = vmatprep.mubr.bf16.mxu0 %v416_v12  ;;  %386 = vmatprep.mubr.bf16.mxu1 %v420_v13 }
  0x2a   :  { %379 = vmatmul.mubr.bf16.gmra.mxu0 %v417_v14  ;;  %387 = vmatmul.mubr.bf16.gmra.mxu1 %v421_v15 }
  0xe2   :  { %v376_v16 = vpop.f32.mrf.mxu0  ;;  %v384_v17 = vpop.f32.mrf.mxu1 }
  0xe3   :  { %241 = vst [vmem:[%s543_s2 + $0x10] sm:$0xff] %v376_v16  ;;  %249 = vst [vmem:[%s543_s2 + $0x50] sm:$0xff] %v384_v17  ;;  %v278_v29 = vmul.f32 %v376_v16, %v376_v16  ;;  %v286_v59 = vmul.f32 %v384_v17, %v384_v17 }
  0xe4   :  { %v176_v18 = vpop.f32.mrf.mxu0  ;;  %v208_v19 = vpop.f32.mrf.mxu1 }
  0xe5   :  { %239 = vst [vmem:[%s543_s2] sm:$0xff] %v176_v18  ;;  %247 = vst [vmem:[%s543_s2 + $0x40] sm:$0xff] %v208_v19  ;;  %v276_v24 = vmul.f32 %v176_v18, %v176_v18  ;;  %v284_v53 = vmul.f32 %v208_v19, %v208_v19 }
  0xe6   :  { %v377_v20 = vpop.f32.mrf.mxu0  ;;  %v385_v21 = vpop.f32.mrf.mxu1 }
  0xe7   :  { %242 = vst [vmem:[%s543_s2 + $0x18] sm:$0xff] %v377_v20  ;;  %250 = vst [vmem:[%s543_s2 + $0x58] sm:$0xff] %v385_v21  ;;  %v279_v34 = vmul.f32 %v377_v20, %v377_v20  ;;  %v287_v62 = vmul.f32 %v385_v21, %v385_v21 }
  0xe8   :  { %v179_v22 = vpop.f32.mrf.mxu0  ;;  %v211_v23 = vpop.f32.mrf.mxu1 }
  0xe9   :  { %240 = vst [vmem:[%s543_s2 + $0x8] sm:$0xff] %v179_v22  ;;  %v255_v25 = vadd.f32 %v179_v22, %v176_v18  ;;  %v277_v26 = vmul.f32 %v179_v22, %v179_v22  ;;  %248 = vst [vmem:[%s543_s2 + $0x48] sm:$0xff] %v211_v23  ;;  %v285_v57 = vmul.f32 %v211_v23, %v211_v23 }
  0xea   :  { %v380_v27 = vpop.f32.mrf.mxu0  ;;  %v388_v28 = vpop.f32.mrf.mxu1 }
  0xeb   :  { %v256_v30 = vadd.f32 %v376_v16, %v255_v25  ;;  %v292_v31 = vadd.f32 %v277_v26, %v276_v24  ;;  %245 = vst [vmem:[%s543_s2 + $0x30] sm:$0xff] %v380_v27  ;;  %253 = vst [vmem:[%s543_s2 + $0x70] sm:$0xff] %v388_v28  ;;  %v282_v47 = vmul.f32 %v380_v27, %v380_v27 }
  0xec   :  { %v192_v32 = vpop.f32.mrf.mxu0  ;;  %v224_v33 = vpop.f32.mrf.mxu1  ;;  %v290_v7 = vmul.f32 %v388_v28, %v388_v28 }
  0xed   :  { %v293_v35 = vadd.f32 %v292_v31, %v278_v29  ;;  %243 = vst [vmem:[%s543_s2 + $0x20] sm:$0xff] %v192_v32  ;;  %v257_v36 = vadd.f32 %v377_v20, %v256_v30  ;;  %251 = vst [vmem:[%s543_s2 + $0x60] sm:$0xff] %v224_v33  ;;  %v280_v40 = vmul.f32 %v192_v32, %v192_v32 }
  0xee   :  { %v381_v37 = vpop.f32.mrf.mxu0  ;;  %v389_v38 = vpop.f32.mrf.mxu1  ;;  %v288_v2 = vmul.f32 %v224_v33, %v224_v33 }
  0xef   :  { %v258_v39 = vadd.f32 %v257_v36, %v192_v32  ;;  %v294_v41 = vadd.f32 %v293_v35, %v279_v34  ;;  %246 = vst [vmem:[%s543_s2 + $0x38] sm:$0xff] %v381_v37  ;;  %254 = vst [vmem:[%s543_s2 + $0x78] sm:$0xff] %v389_v38  ;;  %v283_v50 = vmul.f32 %v381_v37, %v381_v37 }
  0xf0   :  { %v195_v42 = vpop.f32.mrf.mxu0  ;;  %v227_v43 = vpop.f32.mrf.mxu1  ;;  %v291_v10 = vmul.f32 %v389_v38, %v389_v38 }
  0xf1   :  { %v295_v44 = vadd.f32 %v294_v41, %v280_v40  ;;  %244 = vst [vmem:[%s543_s2 + $0x28] sm:$0xff] %v195_v42  ;;  %v259_v45 = vadd.f32 %v258_v39, %v195_v42  ;;  %v281_v46 = vmul.f32 %v195_v42, %v195_v42  ;;  %252 = vst [vmem:[%s543_s2 + $0x68] sm:$0xff] %v227_v43 }
  0xf2   :  { %v289_v6 = vmul.f32 %v227_v43, %v227_v43 }
  0xf3   :  { %v260_v48 = vadd.f32 %v380_v27, %v259_v45  ;;  %v296_v49 = vadd.f32 %v295_v44, %v281_v46 }
  0xf5   :  { %v261_v51 = vadd.f32 %v381_v37, %v260_v48  ;;  %v297_v52 = vadd.f32 %v296_v49, %v282_v47 }
  0xf7   :  { %v298_v54 = vadd.f32 %v297_v52, %v283_v50  ;;  %v262_v55 = vadd.f32 %v261_v51, %v208_v19 }
  0xf9   :  { %v263_v56 = vadd.f32 %v262_v55, %v211_v23  ;;  %v299_v58 = vadd.f32 %v298_v54, %v284_v53 }
  0xfb   :  { %v264_v60 = vadd.f32 %v384_v17, %v263_v56  ;;  %v300_v61 = vadd.f32 %v299_v58, %v285_v57 }
  0xfd   :  { %v301_v63 = vadd.f32 %v300_v61, %v286_v59  ;;  %v265_v0 = vadd.f32 %v385_v21, %v264_v60 }
  0xff   :  { %v266_v1 = vadd.f32 %v265_v0, %v224_v33  ;;  %v302_v3 = vadd.f32 %v301_v63, %v287_v62 }
 0x101   :  { %v303_v4 = vadd.f32 %v302_v3, %v288_v2  ;;  %v267_v5 = vadd.f32 %v266_v1, %v227_v43 }
 0x103   :  { %v268_v8 = vadd.f32 %v388_v28, %v267_v5  ;;  %v304_v9 = vadd.f32 %v303_v4, %v289_v6 }
 0x105   :  { %v269_v11 = vadd.f32 %v389_v38, %v268_v8  ;;  %v305_v12 = vadd.f32 %v304_v9, %v290_v7 }
 0x107   :  { %v270_v13 = vrot.slane %v269_v11, 4  ;;  %v306_v14 = vadd.f32 %v305_v12, %v291_v10 }
 0x109   :  { %v271_v15 = vadd.f32 %v270_v13, %v269_v11  ;;  %v307_v16 = vrot.slane %v306_v14, 4 }
 0x10b   :  { %v272_v17 = vrot.slane %v271_v15, 2  ;;  %v308_v18 = vadd.f32 %v307_v16, %v306_v14 }
 0x10d   :  { %v273_v19 = vadd.f32 %v272_v17, %v271_v15  ;;  %v309_v20 = vrot.slane %v308_v18, 2 }
 0x10f   :  { %v274_v21 = vrot.slane %v273_v19, 1  ;;  %v310_v22 = vadd.f32 %v309_v20, %v308_v18 }
 0x111   :  { %v311_v23 = vrot.slane %v310_v22, 1  ;;  %v275_v24 = vadd.f32 %v274_v21, %v273_v19 }
 0x113   :  { %v312_v25 = vadd.f32 %v311_v23, %v310_v22 }
 0x115   :  { %v314_v26 = vsel %vm313_vm0, %v275_v24, %v312_v25 }
 0x116   :  { %v316_v27 = vsel %vm315_vm1, %v314_v26, 0.0 }
 0x117   :  { %317 = vst [vmem:[%s544_s3] sm:$0xff] %v316_v27 }

</bundles_post_ra>
